<compile_context>
chip_gen: v7x
topology: tpu7x:2x2x1
jax: 0.10.0
libtpu: 0.0.40
codegen_flags: <defaults>
</compile_context>

<pallas_src>
import functools

import jax
import jax.numpy as jnp
from jax.experimental import pallas as pl
from jax.experimental.pallas import tpu as pltpu

LANE = 128     # vreg lane width
SUBLANE = 8    # f32 sublane count


# ----------------------------- kernel ---------------------------------------

def coors_norm_kernel(scale_ref, x_ref, o_ref):
    # forward: coors * scale   (scale is an fp32 scalar parameter in SMEM)
    o_ref[...] = (x_ref[...] * scale_ref[0]).astype(o_ref.dtype)


# ----------------------------- wrapper ---------------------------------------

def coors_norm(coors, scale, *, tile_rows=4096, donate_input=False):
    """CoorsNorm forward: elementwise `coors * scale` for any input shape.

    coors:  arbitrary-shaped float array (e.g. (b, n, 3) coordinates).
    scale:  shape-(1,) learnable scalar parameter.
    """
    orig_shape = coors.shape
    dtype = coors.dtype
    n = coors.size

    # Lane-dense (rows, 128) view.  Only pad to 8x128 alignment (needed for the
    # reshape); the ragged final *block* is handled by Pallas masking, so no
    # per-tile round-up and no extra HBM passes when n is already aligned.
    rows = -(-n // LANE)                       # ceil(n / 128)
    rows8 = -(-rows // SUBLANE) * SUBLANE      # sublane alignment
    padded = rows8 * LANE

    flat = coors.reshape(-1)
    if padded != n:                            # gated: skipped for aligned sizes
        flat = jnp.pad(flat, (0, padded - n))
    x2d = flat.reshape(rows8, LANE)

    # Tile rows: as big as requested, 8-aligned, but keep >= 2 balanced grid
    # steps when the input is large enough so the "parallel" axis can shard
    # across both v7x TensorCores.
    tr = min(int(tile_rows), rows8)
    tr = -(-tr // SUBLANE) * SUBLANE
    if tr >= rows8 and rows8 >= 2 * SUBLANE:
        half = -(-rows8 // 2)
        tr = -(-half // SUBLANE) * SUBLANE

    grid = (-(-rows8 // tr),)

    extra_kwargs = {}
    if donate_input:
        # Alias the flattened input (operand 1; operand 0 is the SMEM scalar)
        # to the output — free footprint/latency win when coors is dead.
        extra_kwargs["input_output_aliases"] = {1: 0}

    out2d = pl.pallas_call(
        coors_norm_kernel,
        out_shape=jax.ShapeDtypeStruct((rows8, LANE), dtype),
        grid_spec=pltpu.PrefetchScalarGridSpec(
            num_scalar_prefetch=0,
            grid=grid,
            in_specs=[
                # scalar parameter -> SMEM (fp32), fetched once, no per-step DMA
                pl.BlockSpec(memory_space=pltpu.MemorySpace.SMEM),
                # lane-dense row tiles of the flattened coordinates
                pl.BlockSpec((tr, LANE), lambda r: (r, 0)),
            ],
            out_specs=pl.BlockSpec((tr, LANE), lambda r: (r, 0)),
        ),
        compiler_params=pltpu.CompilerParams(
            dimension_semantics=("parallel",),      # shards steps across TCs
            vmem_limit_bytes=32 * 1024 * 1024,      # headroom for big tiles
        ),
        **extra_kwargs,
    )(scale.astype(jnp.float32), x2d)

    out = out2d.reshape(-1)
    if padded != n:                            # gated: skipped for aligned sizes
        out = out[:n]
    return out.reshape(orig_shape)


# ----------------------------- reference (pure JAX) ---------------------------

def coors_norm_ref(coors, scale):
    return coors * scale


# ----------------------------- main -------------------------------------------

if __name__ == "__main__":
    root = jax.random.PRNGKey(0)

    # learnable scalar scale parameter (module default scale_init=1.0; use a
    # non-trivial "trained" value so the multiply is actually exercised).
    scale = jnp.full((1,), 1.25, jnp.float32)

    shapes = [
        (2, 1024, 3),   # 6144 elems: 8x128-aligned -> no pad, 2-step grid
        (2, 1181, 3),   # unaligned -> pad path + ragged (masked) final block
        (2, 100, 3),    # tiny: single 8-row tile, 1-step grid
    ]

    key = root
    for shape in shapes:
        key, sub = jax.random.split(key)
        coors = jax.random.normal(sub, shape, jnp.float32)

        out = jax.jit(coors_norm)(coors, scale)
        jax.block_until_ready(out)

        ref = coors_norm_ref(coors, scale)
        assert out.shape == coors.shape
        assert out.dtype == coors.dtype
        assert jnp.allclose(out, ref, atol=1e-6, rtol=1e-6)

    # Exercise the opt-in donated-input path once.
    coors = jax.random.normal(jax.random.PRNGKey(1), (2, 1024, 3), jnp.float32)
    out_d = jax.jit(functools.partial(coors_norm, donate_input=True))(coors, scale)
    jax.block_until_ready(out_d)
    assert jnp.allclose(out_d, coors_norm_ref(coors, scale), atol=1e-6, rtol=1e-6)

    print("KERNEL_OK")
</pallas_src>

<mosaic_0001>
module attributes {stable_mosaic.version = 11 : i64} {
  func.func @coors_norm_kernel(%arg0: i32, %arg1: memref<1xf32, #tpu.memory_space<smem>>, %arg2: memref<24x128xf32, #tpu.memory_space<vmem>>, %arg3: memref<24x128xf32, #tpu.memory_space<vmem>>) attributes {dimension_semantics = [#tpu.dimension_semantics<parallel>], iteration_bounds = array<i64: 2>, scalar_prefetch = 0 : i64, scratch_operands = 0 : i64, tpu.core_type = #tpu.core_type<tc>, window_params = [{transform_indices = @transform_0, window_bounds = array<i64: 1>}, {transform_indices = @transform_1, window_bounds = array<i64: 24, 128>}, {transform_indices = @transform_2, window_bounds = array<i64: 24, 128>}]} {
    %c0 = arith.constant 0 : index
    %c0_0 = arith.constant 0 : index
    %0 = vector.load %arg2[%c0, %c0_0] : memref<24x128xf32, #tpu.memory_space<vmem>>, vector<24x128xf32>
    %c0_1 = arith.constant 0 : index
    %1 = memref.load %arg1[%c0_1] : memref<1xf32, #tpu.memory_space<smem>>
    %2 = vector.broadcast %1 : f32 to vector<24x128xf32>
    %3 = arith.mulf %0, %2 : vector<24x128xf32>
    %c0_2 = arith.constant 0 : index
    %c0_3 = arith.constant 0 : index
    %4 = vector.load %arg3[%c0_2, %c0_3] : memref<24x128xf32, #tpu.memory_space<vmem>>, vector<24x128xf32>
    tpu.vector_store %arg3[%c0_2, %c0_3], %3 {strides = array<i32>} : memref<24x128xf32, #tpu.memory_space<vmem>>, vector<24x128xf32>,
    return
  }
  func.func @transform_0(%arg0: i32) -> i32 {
    %c0_i32 = arith.constant 0 : i32
    %c0_i32_0 = arith.constant 0 : i32
    return %c0_i32 : i32
  }
  func.func @transform_1(%arg0: i32) -> (i32, i32) {
    %c0_i32 = arith.constant 0 : i32
    %c0_i32_0 = arith.constant 0 : i32
    return %arg0, %c0_i32 : i32, i32
  }
  func.func @transform_2(%arg0: i32) -> (i32, i32) {
    %c0_i32 = arith.constant 0 : i32
    %c0_i32_0 = arith.constant 0 : i32
    return %arg0, %c0_i32 : i32, i32
  }
}

</mosaic_0001>

<bundles_post_ra>
// kernel: coors_norm.1
= control target key start
LH: loop header
LB: loop body
LE: loop exit
PB: predicated region body
PF: predicated region fallthrough
CT: control target
= control target key end

     0   :  { %s258_s11 = smov 0   ;;  %s269_s0 = inlined_call_operand.<no memory space> [shape: f32[1], index: 0, kind: input, shape index: {}]   ;;  %s270_s1 = inlined_call_operand.vmem [shape: f32[48,128], index: 1, kind: input, shape index: {}]   ;;  %s271_s2 = inlined_call_operand.vmem [shape: f32[48,128], index: 2, kind: output, shape index: {}]  }
   0x1   :  { %7 = sst [smem:[#allocation2]] %s269_s0 }
   0x2 LB: > { %s215_s12 = sadd.s32 4294967295, %s238_s11   ;;  %p219_p0 = scmp.ge.s32.totalorder %s238_s11, 1  ;;  %s238_s11 = sphi %s258_s11, %s13_s11  }
   0x3   : > { %p114_p1 = scmp.lt.s32.totalorder %s238_s11, 3 }
   0x5   : > { %p115_p2 = pnand %p219_p0, %p114_p1 }
   0x6   : > { %s136_s13 = smul.u32 (!%p115_p2), 3, %s215_s12  ;;  %s151_s14 = sld [smem:[#allocation2]] (!%p115_p2) }
   0x7   : > { %118 = sbr.rel (%p115_p2) target bundleno = 22 (0x16), region = 28 }
   0x8   : > { %p137_p3 = scmp.lt.s32.totalorder (!%p115_p2), %s136_s13, 5 }
   0xc   : > { %v152_v0 = vstv (!%p115_p2), %s151_s14 }
   0xe   : > { %s273_s13 = smov (!%p137_p3, %s136_s13), 5 }
   0xf   : > { %s220_s15 = sshll.u32 %s273_s13, 3 }
  0x10   : > { %s140_s0 = scalar_lea.vmem %s270_s1, %s220_s15  ;;  %s146_s20 = scalar_lea.vmem %s271_s2, %s220_s15 }
  0x11   : > { %v148_v1 = vld [vmem:[%s140_s0] sm:$0xff]  ;;  %v149_v2 = vld [vmem:[%s140_s0 + $0x8] sm:$0xff]  ;;  %v150_v3 = vld [vmem:[%s140_s0 + $0x10] sm:$0xff] }
  0x12   : > { %v153_v4 = vmul.f32 %v152_v0, %v148_v1  ;;  %v154_v5 = vmul.f32 %v152_v0, %v149_v2  ;;  %v155_v6 = vmul.f32 %v152_v0, %v150_v3 }
  0x14   : > { %156 = vst [vmem:[%s146_s20] sm:$0xff] %v153_v4  ;;  %157 = vst [vmem:[%s146_s20 + $0x8] sm:$0xff] %v154_v5 }
  0x15   : > { %158 = vst [vmem:[%s146_s20 + $0x10] sm:$0xff] %v155_v6 }
  0x16 PF: > { %s13_s11 = sadd.s32 1, %s238_s11  }
  0x17   : > { %p10_p4 = scmp.ge.s32.totalorder %s13_s11, 4  }
  0x19   :  { %12 = sbr.rel (!%p10_p4) target bundleno = 2 (0x2), region = 58 }

</bundles_post_ra>
